<compile_context>
chip_gen: v5e
topology: v5e:2x2
jax: 0.10.0
libtpu: 0.0.40
codegen_flags: <defaults>
</compile_context>

<pallas_src>
import math

import jax
import jax.numpy as jnp
from jax.experimental import pallas as pl
from jax.experimental.pallas import tpu as pltpu


EPS = 1e-7
_LANE = 128
_SUBLANE = 8
# Combined (input + output) HBM bytes moved per grid step.  Double-buffered
# this is ~2x => ~20 MiB live VMEM, under the 32 MiB limit we request below.
_TARGET_STEP_BYTES = 10 << 20
_VMEM_LIMIT_BYTES = 32 << 20
# Below this many output bytes per variable, plain jnp beats a pallas launch.
_MIN_PALLAS_BYTES = 256 << 10


def _make_group_kernel(k):
    """Kernel normalizing `k` equally-shaped variables in one grid step.

    Args layout: (param_slab_ref, x_0..x_{k-1}, out_0..out_{k-1}).
    param_slab rows: [mean_0, inv_0, mean_1, inv_1, ...], each of width w.
    """

    def kernel(p_ref, *refs):
        xs, outs = refs[:k], refs[k:]
        for i in range(k):
            x = xs[i][...].astype(jnp.float32)
            mu = p_ref[2 * i : 2 * i + 1, :]       # (1, w) -> broadcast over rows
            inv = p_ref[2 * i + 1 : 2 * i + 2, :]  # (1, w) precomputed 1/(scale+eps)
            outs[i][...] = (x - mu) * inv

    return kernel


def _fold_factor(rows, z):
    """Fold f rows into lanes so the folded width z*f is a multiple of 128."""
    if z % _LANE == 0:
        return 1
    f = _LANE // math.gcd(z, _LANE)
    if rows % f == 0:
        return f
    return 1


def _ceil_to(x, m):
    return -(-x // m) * m


def _pick_row_tile(r, in_bytes_per_row, out_bytes_per_row):
    """Row tile (multiple of 8 unless == r) targeting ~_TARGET_STEP_BYTES/step,
    shaped so the grid has >= 2 (preferably even) steps for v7x TC balance."""
    per_row = max(in_bytes_per_row + out_bytes_per_row, 1)
    t = max(_SUBLANE, (_TARGET_STEP_BYTES // per_row) // _SUBLANE * _SUBLANE)
    if r <= t:
        # Whole array fits in one step: split in two so DMA/compute overlap
        # and both v7x TensorCores get work (rows permitting).
        if r >= 2 * _SUBLANE:
            return _ceil_to(-(-r // 2), _SUBLANE)
        return r
    steps = -(-r // t)
    if steps % 2:  # odd step count -> try an even split (v7x 2-TC balance)
        t_even = max(_SUBLANE, _ceil_to(-(-r // (steps + 1)), _SUBLANE))
        if (-(-r // t_even)) % 2 == 0:
            t = t_even
    return t


def _scale_group_pallas(xs, means, scales, rows, z):
    """Normalize K same-shaped variables with a single pallas_call.

    xs:     K arrays reshapeable to (rows, z), any float dtype
    means:  K arrays of shape (z,)
    scales: K arrays of shape (z,)
    Returns K float32 arrays of shape (rows, z).
    """
    k = len(xs)
    f = _fold_factor(rows, z)
    r, w = rows // f, z * f

    in_bytes_per_row = sum(w * x.dtype.itemsize for x in xs)
    out_bytes_per_row = w * 4 * k
    row_tile = _pick_row_tile(r, in_bytes_per_row, out_bytes_per_row)
    grid = (pl.cdiv(r, row_tile),)

    x_spec = pl.BlockSpec((row_tile, w), lambda i: (i, 0))
    p_spec = pl.BlockSpec((2 * k, w), lambda i: (0, 0))

    # One packed parameter slab per group: rows [mean_i, inv_i] * k, width w.
    p_rows = []
    args = []
    in_specs = [p_spec]
    out_shapes, out_specs = [], []
    for x, mu, sig in zip(xs, means, scales):
        mu2 = mu.reshape(1, z).astype(jnp.float32)
        inv2 = 1.0 / (sig.reshape(1, z).astype(jnp.float32) + EPS)
        if f > 1:
            mu2 = jnp.tile(mu2, (1, f))
            inv2 = jnp.tile(inv2, (1, f))
        p_rows += [mu2, inv2]
        args.append(x.reshape(r, w))  # keep input dtype; cast happens on the VPU
        in_specs.append(x_spec)
        out_shapes.append(jax.ShapeDtypeStruct((r, w), jnp.float32))
        out_specs.append(x_spec)
    param_slab = jnp.concatenate(p_rows, axis=0)  # (2k, w)

    outs = pl.pallas_call(
        _make_group_kernel(k),
        out_shape=tuple(out_shapes),
        grid_spec=pltpu.PrefetchScalarGridSpec(
            num_scalar_prefetch=0,
            grid=grid,
            in_specs=in_specs,
            out_specs=out_specs,
        ),
        compiler_params=pltpu.CompilerParams(
            dimension_semantics=("parallel",),
            vmem_limit_bytes=_VMEM_LIMIT_BYTES,
        ),
    )(param_slab, *args)

    if k == 1:
        outs = (outs,) if not isinstance(outs, (tuple, list)) else outs
    return [o.reshape(rows, z) for o in outs]


def scaler_forward(x_dict, mean_dict, scale_dict, *, min_pallas_bytes=_MIN_PALLAS_BYTES):
    """Mirror of Scaler.forward: dict-in, dict-out."""
    out = {}
    groups = {}  # (rows, z) -> [keys]; fused into one pallas_call each
    for key, x in x_dict.items():
        if key in scale_dict and key in mean_dict:
            z = x.shape[-1]
            rows = x.size // z
            if rows * z * 4 < min_pallas_bytes:
                # Tiny variable: XLA fusion beats pallas launch overhead.
                mu = mean_dict[key].astype(jnp.float32)
                inv = 1.0 / (scale_dict[key].astype(jnp.float32) + EPS)
                out[key] = (x.astype(jnp.float32) - mu) * inv
            else:
                groups.setdefault((rows, z), []).append(key)
        else:
            out[key] = x

    for (rows, z), keys in groups.items():
        res = _scale_group_pallas(
            [x_dict[kk] for kk in keys],
            [mean_dict[kk] for kk in keys],
            [scale_dict[kk] for kk in keys],
            rows,
            z,
        )
        for kk, rarr in zip(keys, res):
            out[kk] = rarr.reshape(x_dict[kk].shape)
    return out


if __name__ == "__main__":
    key = jax.random.PRNGKey(0)
    k1, k2, k3, k4, k5, k6, k7, k8 = jax.random.split(key, 8)

    B, T, Z = 2, 8, 32   # batch, time, vertical/feature (normalized) dim
    ZU = 34              # non-power-of-two feature dim (exercises lane folding)

    # Input dict of variables; "SHF" intentionally has no mean/scale (passthrough).
    x = {
        "QT": jax.random.normal(k1, (B, T, Z), jnp.float32) * 3.0 + 1.5,
        "SLI": jax.random.normal(k2, (B, T, Z), jnp.float32) * 10.0 + 280.0,
        "U": jax.random.normal(k6, (4, 128, ZU), jnp.float32) * 5.0,
        "SHF": jax.random.normal(k3, (B, T), jnp.float32),
    }

    # Deterministic "fitted" per-feature mean/scale parameters (shape [Z]).
    mean = {
        "QT": jax.random.normal(k4, (Z,), jnp.float32) * 0.5 + 1.0,
        "SLI": jnp.linspace(270.0, 290.0, Z, dtype=jnp.float32),
        "U": jax.random.normal(k7, (ZU,), jnp.float32),
    }
    scale = {
        "QT": jnp.abs(jax.random.normal(k5, (Z,), jnp.float32)) + 0.5,
        "SLI": jnp.linspace(1.0, 5.0, Z, dtype=jnp.float32),
        "U": jnp.abs(jax.random.normal(k8, (ZU,), jnp.float32)) + 0.2,
    }

    def reference(kk):
        mu = mean[kk].reshape((1,) * (x[kk].ndim - 1) + (-1,))
        sg = scale[kk].reshape((1,) * (x[kk].ndim - 1) + (-1,))
        return (x[kk] - mu) / (sg + EPS)

    # 1) Force the Pallas path even at these small demo shapes.
    out = scaler_forward(x, mean, scale, min_pallas_bytes=0)
    out = jax.tree_util.tree_map(jax.block_until_ready, out)
    for kk in ("QT", "SLI", "U"):
        assert out[kk].dtype == jnp.float32, kk
        assert jnp.allclose(out[kk], reference(kk), atol=1e-5, rtol=1e-5), kk
    assert jnp.array_equal(out["SHF"], x["SHF"])

    # 2) Default thresholds: small variables take the jnp fast path; results match.
    out_fast = scaler_forward(x, mean, scale)
    out_fast = jax.tree_util.tree_map(jax.block_until_ready, out_fast)
    for kk in ("QT", "SLI", "U"):
        assert jnp.allclose(out_fast[kk], reference(kk), atol=1e-5, rtol=1e-5), kk
    assert jnp.array_equal(out_fast["SHF"], x["SHF"])

    print("KERNEL_OK")
</pallas_src>

<mosaic_0001>
module attributes {stable_mosaic.version = 11 : i64} {
  func.func @kernel(%arg0: i32, %arg1: memref<4x128xf32, #tpu.memory_space<vmem>>, %arg2: memref<4x128xf32, #tpu.memory_space<vmem>>, %arg3: memref<4x128xf32, #tpu.memory_space<vmem>>, %arg4: memref<4x128xf32, #tpu.memory_space<vmem>>, %arg5: memref<4x128xf32, #tpu.memory_space<vmem>>) attributes {dimension_semantics = [#tpu.dimension_semantics<parallel>], iteration_bounds = array<i64: 1>, scalar_prefetch = 0 : i64, scratch_operands = 0 : i64, tpu.core_type = #tpu.core_type<tc>, window_params = [{pipeline_mode = #tpu.pipeline_mode<synchronous>, transform_indices = @transform_0, window_bounds = array<i64: 4, 128>}, {transform_indices = @transform_1, window_bounds = array<i64: 4, 128>}, {transform_indices = @transform_2, window_bounds = array<i64: 4, 128>}, {transform_indices = @transform_3, window_bounds = array<i64: 4, 128>}, {transform_indices = @transform_4, window_bounds = array<i64: 4, 128>}]} {
    %c0 = arith.constant 0 : index
    %c0_0 = arith.constant 0 : index
    %0 = vector.load %arg2[%c0, %c0_0] : memref<4x128xf32, #tpu.memory_space<vmem>>, vector<4x128xf32>
    %c0_1 = arith.constant 0 : index
    %c0_2 = arith.constant 0 : index
    %1 = vector.load %arg1[%c0_1, %c0_2] : memref<4x128xf32, #tpu.memory_space<vmem>>, vector<1x128xf32>
    %c1 = arith.constant 1 : index
    %c0_3 = arith.constant 0 : index
    %2 = vector.load %arg1[%c1, %c0_3] : memref<4x128xf32, #tpu.memory_space<vmem>>, vector<1x128xf32>
    %3 = vector.broadcast %1 : vector<1x128xf32> to vector<4x128xf32>
    %4 = arith.subf %0, %3 : vector<4x128xf32>
    %5 = vector.broadcast %2 : vector<1x128xf32> to vector<4x128xf32>
    %6 = arith.mulf %4, %5 : vector<4x128xf32>
    %c0_4 = arith.constant 0 : index
    %c0_5 = arith.constant 0 : index
    %7 = vector.load %arg4[%c0_4, %c0_5] : memref<4x128xf32, #tpu.memory_space<vmem>>, vector<4x128xf32>
    tpu.vector_store %arg4[%c0_4, %c0_5], %6 {strides = array<i32>} : memref<4x128xf32, #tpu.memory_space<vmem>>, vector<4x128xf32>,
    %c0_6 = arith.constant 0 : index
    %c0_7 = arith.constant 0 : index
    %8 = vector.load %arg3[%c0_6, %c0_7] : memref<4x128xf32, #tpu.memory_space<vmem>>, vector<4x128xf32>
    %c2 = arith.constant 2 : index
    %c0_8 = arith.constant 0 : index
    %9 = vector.load %arg1[%c2, %c0_8] : memref<4x128xf32, #tpu.memory_space<vmem>>, vector<1x128xf32>
    %c3 = arith.constant 3 : index
    %c0_9 = arith.constant 0 : index
    %10 = vector.load %arg1[%c3, %c0_9] : memref<4x128xf32, #tpu.memory_space<vmem>>, vector<1x128xf32>
    %11 = vector.broadcast %9 : vector<1x128xf32> to vector<4x128xf32>
    %12 = arith.subf %8, %11 : vector<4x128xf32>
    %13 = vector.broadcast %10 : vector<1x128xf32> to vector<4x128xf32>
    %14 = arith.mulf %12, %13 : vector<4x128xf32>
    %c0_10 = arith.constant 0 : index
    %c0_11 = arith.constant 0 : index
    %15 = vector.load %arg5[%c0_10, %c0_11] : memref<4x128xf32, #tpu.memory_space<vmem>>, vector<4x128xf32>
    tpu.vector_store %arg5[%c0_10, %c0_11], %14 {strides = array<i32>} : memref<4x128xf32, #tpu.memory_space<vmem>>, vector<4x128xf32>,
    return
  }
  func.func @transform_0(%arg0: i32) -> (i32, i32) {
    %c0_i32 = arith.constant 0 : i32
    %c0_i32_0 = arith.constant 0 : i32
    %c0_i32_1 = arith.constant 0 : i32
    return %c0_i32, %c0_i32_0 : i32, i32
  }
  func.func @transform_1(%arg0: i32) -> (i32, i32) {
    %c0_i32 = arith.constant 0 : i32
    %c0_i32_0 = arith.constant 0 : i32
    return %arg0, %c0_i32 : i32, i32
  }
  func.func @transform_2(%arg0: i32) -> (i32, i32) {
    %c0_i32 = arith.constant 0 : i32
    %c0_i32_0 = arith.constant 0 : i32
    return %arg0, %c0_i32 : i32, i32
  }
  func.func @transform_3(%arg0: i32) -> (i32, i32) {
    %c0_i32 = arith.constant 0 : i32
    %c0_i32_0 = arith.constant 0 : i32
    return %arg0, %c0_i32 : i32, i32
  }
  func.func @transform_4(%arg0: i32) -> (i32, i32) {
    %c0_i32 = arith.constant 0 : i32
    %c0_i32_0 = arith.constant 0 : i32
    return %arg0, %c0_i32 : i32, i32
  }
}

</mosaic_0001>

<bundles_post_ra>
// kernel: tpu_custom_call.1
= control target key start
LH: loop header
LB: loop body
LE: loop exit
PB: predicated region body
PF: predicated region fallthrough
CT: control target
= control target key end

     0   :  { %10 = vsyncpa [#allocation3], 0  ;;  %s291_s0 = inlined_call_operand.hbm [shape: f32[4,128], index: 0, kind: input, shape index: {}]   ;;  %s292_s1 = inlined_call_operand.hbm [shape: f32[4,128], index: 1, kind: input, shape index: {}]   ;;  %s293_s2 = inlined_call_operand.hbm [shape: f32[4,128], index: 2, kind: input, shape index: {}]   ;;  %s294_s3 = inlined_call_operand.hbm [shape: f32[4,128], index: 3, kind: output, shape index: {0}]   ;;  %s295_s4 = inlined_call_operand.hbm [shape: f32[4,128], index: 4, kind: output, shape index: {1}]  }
   0x1   :  { %11 = vsyncpa [#allocation6], 0 }
   0x2   :  { %12 = vsyncpa [#allocation4], 0  ;;  %s30_s17 = sshll.u32 %s292_s1, 4  ;;  %s31_s17 = int_to_ptr.hbm [resolvable:$true] %s30_s17 }
   0x3   :  { %13 = vsyncpa [#allocation10], 0  ;;  %s246_s18 = smov [#allocation5]   ;;  %s19_s22 = sshll.u32 %s291_s0, 4  ;;  %s20_s22 = int_to_ptr.hbm [resolvable:$true] %s19_s22 }
   0x4   :  { %s32_s19 = sshll.u32 %s246_s18, 4  ;;  %s247_s23 = smov [#allocation2]   ;;  %s33_s19 = int_to_ptr.vmem [resolvable:$true] %s32_s19 }
   0x5   :  { %35 = dma.hbm_to_vmem [thread:$0]  %s31_s17, 64, %s33_s19, [#allocation6]  }
   0x6   :  { %s21_s24 = sshll.u32 %s247_s23, 4  ;;  %s41_s27 = sshll.u32 %s293_s2, 4  ;;  %s22_s24 = int_to_ptr.vmem [resolvable:$true] %s21_s24  ;;  %s42_s27 = int_to_ptr.hbm [resolvable:$true] %s41_s27 }
   0x7   :  { %24 = dma.hbm_to_vmem [thread:$0]  %s20_s22, 64, %s22_s24, [#allocation3]  }
   0x8   :  { %s248_s1 = smov [#allocation7]  }
   0x9   :  { %s43_s28 = sshll.u32 %s248_s1, 4  ;;  %s44_s28 = int_to_ptr.vmem [resolvable:$true] %s43_s28 }
   0xa   :  { %46 = dma.hbm_to_vmem [thread:$0]  %s42_s27, 64, %s44_s28, [#allocation6]  }
   0xb   :  { %238 = dma.done.wait [#allocation3], 64  }
   0xc   :  { %239 = vsyncadd [#allocation3], 4294967232 }
   0xd   :  { %240 = dma.done.wait [#allocation6], 128  }
   0xe   :  { %241 = vsyncadd [#allocation6], 4294967168  ;;  %s82_s30 = sshll.u32 %s294_s3, 4  ;;  %s249_s5 = smov [#allocation8]   ;;  %v59_v0 = vld [vmem:[#allocation5] sm:$0xf]  ;;  %s83_s30 = int_to_ptr.hbm [resolvable:$true] %s82_s30 }
   0xf   :  { %s80_s6 = sshll.u32 %s249_s5, 4  ;;  %v114_v1 = vld [vmem:[#allocation2] ss:$0 sm:$0xff]  ;;  %v115_v2 = vld [vmem:[#allocation2 + $0x1] ss:$0 sm:$0xff]  ;;  %s250_s2 = smov [#allocation9]   ;;  %s81_s6 = int_to_ptr.vmem [resolvable:$true] %s80_s6 }
  0x10   :  { %v67_v3 = vld [vmem:[#allocation7] sm:$0xf]  ;;  %v116_v4 = vld [vmem:[#allocation2 + $0x2] ss:$0 sm:$0xff]  ;;  %v63_v5 = vsub.f32 %v59_v0, %v114_v1  ;;  %v117_v6 = vld [vmem:[#allocation2 + $0x3] ss:$0 sm:$0xff] }
  0x11   :  { %s91_s7 = sshll.u32 %s250_s2, 4  ;;  %s93_s10 = sshll.u32 %s295_s4, 4  ;;  %v71_v7 = vsub.f32 %v67_v3, %v116_v4  ;;  %s92_s7 = int_to_ptr.vmem [resolvable:$true] %s91_s7  ;;  %s94_s10 = int_to_ptr.hbm [resolvable:$true] %s93_s10 }
  0x12   :  { %v65_v8 = vmul.f32 %v115_v2, %v63_v5 }
  0x13   :  { %v73_v9 = vmul.f32 %v117_v6, %v71_v7 }
  0x14   :  { %66 = vst [vmem:[#allocation8] sm:$0xf] %v65_v8 }
  0x15   :  { %74 = vst [vmem:[#allocation9] sm:$0xf] %v73_v9  ;;  %85 = dma.vmem_to_hbm [thread:$0]  %s81_s6, 64, %s83_s30, [#allocation4]  }
  0x16   :  { %96 = dma.vmem_to_hbm [thread:$0]  %s92_s7, 64, %s94_s10, [#allocation10]  }
  0x17   :  { %242 = dma.done.wait [#allocation4], 64  }
  0x18   :  { %243 = vsyncadd [#allocation4], 4294967232 }
  0x19   :  { %244 = dma.done.wait [#allocation10], 64  }
  0x1a   :  { %245 = vsyncadd [#allocation10], 4294967232 }
  0x1b   :  { %105 = vsyncpa [#allocation3], 1 }
  0x1c   :  { %106 = vsyncpa [#allocation6], 1 }
  0x1d   :  { %107 = vsyncpa [#allocation4], 1 }
  0x1e   :  { %108 = vsyncpa [#allocation10], 1 }

</bundles_post_ra>
